<compile_context>
chip_gen: v5e
topology: v5e:2x2
jax: 0.10.0
libtpu: 0.0.40
codegen_flags: <defaults>
</compile_context>

<pallas_src>
import functools

import jax
import jax.numpy as jnp
from jax.experimental import pallas as pl
from jax.experimental.pallas import tpu as pltpu


def _round_up(x, m):
    return ((x + m - 1) // m) * m


def _balanced_tile(size, tmax, align):
    """Largest aligned tile <= tmax that (roughly) minimizes padding waste."""
    size = max(int(size), 1)
    aligned = _round_up(size, align)
    if aligned <= tmax:
        return aligned
    n_tiles = -(-size // tmax)                 # ceil
    return _round_up(-(-size // n_tiles), align)


# --------------------------------------------------------------------------
# Kernels
# --------------------------------------------------------------------------

def _lm_head_kernel_multi_k(x_ref, w_ref, b_ref, o_ref, acc_ref):
    # x_ref: (tm, tk) bf16   w_ref: (tk, tn) bf16   b_ref: (1, tn) f32
    # o_ref: (tm, tn) out    acc_ref: (tm, tn) f32 K-resident accumulator
    k = pl.program_id(2)

    @pl.when(k == 0)
    def _():
        # Bias folded into the accumulator init -> finalize is just cast+store.
        acc_ref[...] = jnp.broadcast_to(b_ref[...], acc_ref.shape)

    acc_ref[...] += jnp.dot(
        x_ref[...], w_ref[...], preferred_element_type=jnp.float32
    )

    @pl.when(k == pl.num_programs(2) - 1)
    def _():
        o_ref[...] = acc_ref[...].astype(o_ref.dtype)


def _lm_head_kernel_single_k(x_ref, w_ref, b_ref, o_ref):
    # Whole hidden dim fits in one K tile: no grid K axis, no scratch.
    o_ref[...] = (
        jnp.dot(x_ref[...], w_ref[...], preferred_element_type=jnp.float32)
        + b_ref[...]
    ).astype(o_ref.dtype)


# --------------------------------------------------------------------------
# Wrapper
# --------------------------------------------------------------------------

@functools.partial(
    jax.jit, static_argnames=("V", "tm_max", "tn", "tk", "out_dtype")
)
def lm_head_logits(x, w_pad, b_pad, *, V, tm_max, tn, tk, out_dtype):
    """x: [B, S, H] f32/bf16 hidden states.  w_pad: [H_pad, V_pad] bf16 (pre-padded).
    b_pad: [1, V_pad] f32 (pre-padded).  Returns logits [B, S, V] in out_dtype.
    """
    B, S, H = x.shape
    H_pad, V_pad = w_pad.shape
    M = B * S

    # Rows tile: as large as possible (minimizes W re-streaming), 16-aligned for
    # bf16 sublane packing, balanced so M_pad wastes little padding.
    tm = _balanced_tile(M, tm_max, 16)
    M_pad = _round_up(M, tm)

    n_n = V_pad // tn
    n_m = M_pad // tm
    n_k = H_pad // tk

    x2 = x.reshape(M, H).astype(jnp.bfloat16)
    x2 = jnp.pad(x2, ((0, M_pad - M), (0, H_pad - H)))

    out_itemsize = jnp.dtype(out_dtype).itemsize
    cost = pl.CostEstimate(
        flops=2 * M * H * V,
        transcendentals=0,
        bytes_accessed=(
            x2.size * 2 + w_pad.size * 2 + b_pad.size * 4
            + M_pad * V_pad * out_itemsize
        ),
    )

    if n_k == 1:
        # Fast path: no K reduction axis, no accumulator scratch.
        out = pl.pallas_call(
            _lm_head_kernel_single_k,
            out_shape=jax.ShapeDtypeStruct((M_pad, V_pad), out_dtype),
            grid_spec=pltpu.PrefetchScalarGridSpec(
                num_scalar_prefetch=0,
                grid=(n_n, n_m),                       # vocab outer, rows inner
                in_specs=[
                    pl.BlockSpec((tm, H_pad), lambda j, i: (i, 0)),   # x
                    pl.BlockSpec((H_pad, tn), lambda j, i: (0, j)),   # w
                    pl.BlockSpec((1, tn), lambda j, i: (0, j)),       # bias
                ],
                out_specs=pl.BlockSpec((tm, tn), lambda j, i: (i, j)),
            ),
            compiler_params=pltpu.CompilerParams(
                dimension_semantics=("parallel", "parallel"),
                vmem_limit_bytes=40 * 1024 * 1024,
            ),
            cost_estimate=cost,
        )(x2, w_pad, b_pad)
    else:
        out = pl.pallas_call(
            _lm_head_kernel_multi_k,
            out_shape=jax.ShapeDtypeStruct((M_pad, V_pad), out_dtype),
            grid_spec=pltpu.PrefetchScalarGridSpec(
                num_scalar_prefetch=0,
                grid=(n_n, n_m, n_k),                  # vocab, rows, K (reduction last)
                in_specs=[
                    pl.BlockSpec((tm, tk), lambda j, i, k: (i, k)),   # x
                    pl.BlockSpec((tk, tn), lambda j, i, k: (k, j)),   # w
                    pl.BlockSpec((1, tn), lambda j, i, k: (0, j)),    # bias
                ],
                out_specs=pl.BlockSpec((tm, tn), lambda j, i, k: (i, j)),
                scratch_shapes=[pltpu.VMEM((tm, tn), jnp.float32)],
            ),
            compiler_params=pltpu.CompilerParams(
                dimension_semantics=("parallel", "parallel", "arbitrary"),
                vmem_limit_bytes=40 * 1024 * 1024,
            ),
            cost_estimate=cost,
        )(x2, w_pad, b_pad)

    return out[:M, :V].reshape(B, S, V)


class EditableModelPallas:
    """Mirror of EditableModel: forward(*inputs) -> _logits(model(*inputs)).

    The wrapped `model` is a deterministic synthetic LM head applied to
    pre-computed hidden states; its matmul hot path runs in Pallas.  Weights
    are cast to bf16 and padded to the tile grid ONCE here (hoisted out of the
    per-call forward path).
    """

    def __init__(self, w, b, *, out_dtype=jnp.bfloat16,
                 tm_max=512, tn_max=1024, tk_max=2048):
        H, V = w.shape
        self.V = int(V)
        self.out_dtype = out_dtype
        self.tm_max = int(tm_max)
        # Lane-aligned vocab / hidden tiles, chosen once per model.
        self.tn = _balanced_tile(V, tn_max, 128)
        self.tk = _balanced_tile(H, tk_max, 128)
        V_pad = _round_up(V, self.tn)
        H_pad = _round_up(H, self.tk)
        # Pre-cast + pre-pad the LM-head weight & bias once.
        self.w_pad = jnp.pad(
            w.astype(jnp.bfloat16), ((0, H_pad - H), (0, V_pad - V))
        )
        self.b_pad = jnp.pad(
            b.astype(jnp.float32), (0, V_pad - V)
        ).reshape(1, V_pad)

    def model(self, hidden_states):
        return lm_head_logits(
            hidden_states, self.w_pad, self.b_pad,
            V=self.V, tm_max=self.tm_max, tn=self.tn, tk=self.tk,
            out_dtype=self.out_dtype,
        )

    def forward(self, *inputs, **kwargs):
        # _logits() simply extracts the logits tensor; our model returns it
        # directly, so forward is the model call itself.
        return self.model(*inputs, **kwargs)

    __call__ = forward


if __name__ == "__main__":
    key = jax.random.PRNGKey(0)
    keys = jax.random.split(key, 6)

    # Case 1: small decode-like shape -> single-K-tile fast path.
    B, S, H, V = 2, 8, 32, 128
    x = jax.random.normal(keys[0], (B, S, H), dtype=jnp.float32)
    w = jax.random.normal(keys[1], (H, V), dtype=jnp.float32) * 0.02
    b = jax.random.normal(keys[2], (V,), dtype=jnp.float32) * 0.01

    editable = EditableModelPallas(w, b)
    logits = editable(x)
    jax.block_until_ready(logits)

    ref = jnp.einsum("bsh,hv->bsv", x, w) + b
    assert logits.shape == (B, S, V)
    assert jnp.allclose(logits.astype(jnp.float32), ref, atol=2e-2, rtol=2e-2)

    # Case 2: exercise the K-resident accumulator path (multiple K tiles).
    B2, S2, H2, V2 = 2, 8, 256, 384
    x2 = jax.random.normal(keys[3], (B2, S2, H2), dtype=jnp.float32)
    w2 = jax.random.normal(keys[4], (H2, V2), dtype=jnp.float32) * 0.02
    b2 = jax.random.normal(keys[5], (V2,), dtype=jnp.float32) * 0.01

    editable2 = EditableModelPallas(w2, b2, tn_max=128, tk_max=128)
    logits2 = editable2(x2)
    jax.block_until_ready(logits2)

    ref2 = jnp.einsum("bsh,hv->bsv", x2, w2) + b2
    assert logits2.shape == (B2, S2, V2)
    assert jnp.allclose(logits2.astype(jnp.float32), ref2, atol=2e-2, rtol=2e-2)

    print("KERNEL_OK")
</pallas_src>

<mosaic_0001>
module attributes {stable_mosaic.version = 11 : i64} {
  func.func @_lm_head_kernel_single_k(%arg0: i32, %arg1: i32, %arg2: memref<16x128xbf16, #tpu.memory_space<vmem>>, %arg3: memref<128x128xbf16, #tpu.memory_space<vmem>>, %arg4: memref<1x128xf32, #tpu.memory_space<vmem>>, %arg5: memref<16x128xbf16, #tpu.memory_space<vmem>>) attributes {dimension_semantics = [#tpu.dimension_semantics<parallel>, #tpu.dimension_semantics<parallel>], iteration_bounds = array<i64: 1, 1>, scalar_prefetch = 0 : i64, scratch_operands = 0 : i64, tpu.core_type = #tpu.core_type<tc>, window_params = [{transform_indices = @transform_0, window_bounds = array<i64: 16, 128>}, {transform_indices = @transform_1, window_bounds = array<i64: 128, 128>}, {transform_indices = @transform_2, window_bounds = array<i64: 1, 128>}, {transform_indices = @transform_3, window_bounds = array<i64: 16, 128>}]} {
    %c0 = arith.constant 0 : index
    %c0_0 = arith.constant 0 : index
    %0 = vector.load %arg2[%c0, %c0_0] : memref<16x128xbf16, #tpu.memory_space<vmem>>, vector<16x128xbf16>
    %c0_1 = arith.constant 0 : index
    %c0_2 = arith.constant 0 : index
    %1 = vector.load %arg3[%c0_1, %c0_2] : memref<128x128xbf16, #tpu.memory_space<vmem>>, vector<128x128xbf16>
    %cst = arith.constant dense<0.000000e+00> : vector<16x128xf32>
    %2 = tpu.matmul %0, %1, %cst {dimension_numbers = #tpu.dot_dimension_numbers<[1], [0], [0], [1], [0, 0, 1, 1], [], []>} : vector<16x128xbf16>, vector<128x128xbf16>, vector<16x128xf32> -> vector<16x128xf32>
    %c0_3 = arith.constant 0 : index
    %c0_4 = arith.constant 0 : index
    %3 = vector.load %arg4[%c0_3, %c0_4] : memref<1x128xf32, #tpu.memory_space<vmem>>, vector<1x128xf32>
    %4 = vector.broadcast %3 : vector<1x128xf32> to vector<16x128xf32>
    %5 = arith.addf %2, %4 : vector<16x128xf32>
    %6 = arith.truncf %5 : vector<16x128xf32> to vector<16x128xbf16>
    %c0_5 = arith.constant 0 : index
    %c0_6 = arith.constant 0 : index
    %7 = vector.load %arg5[%c0_5, %c0_6] : memref<16x128xbf16, #tpu.memory_space<vmem>>, vector<16x128xbf16>
    tpu.vector_store %arg5[%c0_5, %c0_6], %6 {strides = array<i32>} : memref<16x128xbf16, #tpu.memory_space<vmem>>, vector<16x128xbf16>,
    return
  }
  func.func @transform_0(%arg0: i32, %arg1: i32) -> (i32, i32) {
    %c0_i32 = arith.constant 0 : i32
    %c0_i32_0 = arith.constant 0 : i32
    return %arg1, %c0_i32 : i32, i32
  }
  func.func @transform_1(%arg0: i32, %arg1: i32) -> (i32, i32) {
    %c0_i32 = arith.constant 0 : i32
    %c0_i32_0 = arith.constant 0 : i32
    return %c0_i32, %arg0 : i32, i32
  }
  func.func @transform_2(%arg0: i32, %arg1: i32) -> (i32, i32) {
    %c0_i32 = arith.constant 0 : i32
    %c0_i32_0 = arith.constant 0 : i32
    return %c0_i32, %arg0 : i32, i32
  }
  func.func @transform_3(%arg0: i32, %arg1: i32) -> (i32, i32) {
    %c0_i32 = arith.constant 0 : i32
    return %arg1, %arg0 : i32, i32
  }
}

</mosaic_0001>

<bundles_post_ra>
// kernel: lm_head_logits.1
= control target key start
LH: loop header
LB: loop body
LE: loop exit
PB: predicated region body
PF: predicated region fallthrough
CT: control target
= control target key end

     0   :  { %8 = vsyncpa [#allocation3], 0  ;;  %s293_s0 = inlined_call_operand.vmem [shape: bf16[16,128], index: 0, kind: input, shape index: {}]   ;;  %s294_s1 = inlined_call_operand.hbm [shape: bf16[128,128], index: 1, kind: input, shape index: {}]   ;;  %s295_s2 = inlined_call_operand.vmem [shape: f32[1,128], index: 2, kind: input, shape index: {}]   ;;  %s296_s3 = inlined_call_operand.hbm [shape: bf16[16,128], index: 3, kind: output, shape index: {}]  }
   0x1   :  { %9 = vsyncpa [#allocation4], 0  ;;  %s16_s14 = sshll.u32 %s294_s1, 4  ;;  %s251_s15 = smov [#allocation2]   ;;  %s17_s14 = int_to_ptr.hbm [resolvable:$true] %s16_s14 }
   0x2   :  { %s18_s16 = sshll.u32 %s251_s15, 4  ;;  %s252_s17 = smov 64   ;;  %s19_s16 = int_to_ptr.vmem [resolvable:$true] %s18_s16 }
   0x3   :  { %s253_s18 = smov 4  }
   0x4   :  { %24 = dma.hbm_to_vmem [thread:$0]  %s17_s14, 1024, %s19_s16, [#allocation3], %s252_s17, %s252_s17, %s253_s18  }
   0x5   :  { %247 = dma.done.wait [#allocation3], 1024  }
   0x6   :  { %248 = vsyncadd [#allocation3], 4294966272  ;;  %v188_v0 = vld [vmem:[#allocation2 + $0x38] sm:$0xff]  ;;  %v187_v1 = vld [vmem:[#allocation2 + $0x30] sm:$0xff]  ;;  %s254_s22 = smov [#allocation5]   ;;  %s131_s26 = sshll.u32 %s296_s3, 4  ;;  %s132_s26 = int_to_ptr.hbm [resolvable:$true] %s131_s26 }
   0x7   :  { %107 = vmatpush.bf16.msra.mxu0 %v188_v0  ;;  %v186_v2 = vld [vmem:[#allocation2 + $0x28] sm:$0xff]  ;;  %v185_v3 = vld [vmem:[#allocation2 + $0x20] sm:$0xff]  ;;  %v184_v4 = vld [vmem:[#allocation2 + $0x18] sm:$0xff]  ;;  %s129_s23 = sshll.u32 %s254_s22, 4  ;;  %s130_s23 = int_to_ptr.vmem [resolvable:$true] %s129_s23 }
   0x8   :  { %v183_v5 = vld [vmem:[#allocation2 + $0x10] sm:$0xff]  ;;  %v182_v6 = vld [vmem:[#allocation2 + $0x8] sm:$0xff]  ;;  %v181_v7 = vld [vmem:[#allocation2] sm:$0xff] }
   0x9   :  { %v180_v8 = vld [vmem:[%s293_s0] sm:$0xff] }
   0xa   :  { %v198_v10 = vld [vmem:[%s295_s2] ss:$0 sm:$0xff] }
   0xb   :  { %108 = vmatpush.bf16.msra.mxu0 %v187_v1 }
   0xf   :  { %109 = vmatpush.bf16.msra.mxu0 %v186_v2 }
  0x13   :  { %110 = vmatpush.bf16.msra.mxu0 %v185_v3 }
  0x17   :  { %111 = vmatpush.bf16.msra.mxu0 %v184_v4 }
  0x1b   :  { %112 = vmatpush.bf16.msra.mxu0 %v183_v5 }
  0x1f   :  { %113 = vmatpush.bf16.msra.mxu0 %v182_v6 }
  0x23   :  { %114 = vmatpush.bf16.msra.mxu0 %v181_v7 }
  0x26   :  { %115 = vmatmul.bf16.vlgmr.msra.gmra.mxu0 %v180_v8 }
  0xa3   :  { %v116_v9 = vpop.f32.mrf.mxu0 }
  0xa4   :  { %v117_v12 = vadd.f32 %v198_v10, %v116_v9 }
  0xab   :  { %v118_v11 = vpop.f32.mrf.mxu0 }
  0xac   :  { %v119_v13 = vadd.f32 %v198_v10, %v118_v11 }
  0xae   :  { %v192_v14 = vpack.c.bf16 %v119_v13, %v117_v12 }
  0xb0   :  { %193 = vst [vmem:[#allocation5] sm:$0xff] %v192_v14  }
  0xb1   :  { %137 = dma.vmem_to_hbm [thread:$0]  %s130_s23, 128, %s132_s26, [#allocation4], %s252_s17, %s252_s17, %s253_s18  }
  0xb2   :  { %249 = dma.done.wait [#allocation4], 128  }
  0xb3   :  { %250 = vsyncadd [#allocation4], 4294967168 }
  0xb4   :  { %142 = vsyncpa [#allocation3], 1 }
  0xb5   :  { %143 = vsyncpa [#allocation4], 1 }

</bundles_post_ra>
